<compile_context>
chip_gen: v5e
topology: v5e:2x2
jax: 0.10.0
libtpu: 0.0.40
codegen_flags: <defaults>
</compile_context>

<pallas_src>
import functools

import jax
import jax.numpy as jnp
from jax.experimental import pallas as pl
from jax.experimental.pallas import tpu as pltpu

_LANE = 128
_SUBLANE = 8
_TARGET_BLOCK_BYTES = 4 * 1024 * 1024   # ~4 MiB per block (per buffer)
_MIN_GRID = 4                            # >= 2 steps per TensorCore on v7x megacore


def _mila_math(x_f32, beta):
    """Returns (x*num, den) with tanh(softplus(beta+x)) = num/den, one exp total.

    tanh(ln(1+e^z)) = (u^2-1)/(u^2+1), u = 1+e^z; with t = exp(-|z|):
      z >  0: (1 + 2t)   / (1 + 2t + 2t^2)
      z <= 0: (2t + t^2) / (2 + 2t + t^2)
    Stable in both tails; single EUP exp per element.
    """
    z = x_f32 + beta
    t = jnp.exp(-jnp.abs(z))
    t2 = t * t
    pos = z > 0
    num = jnp.where(pos, 1.0 + 2.0 * t, 2.0 * t + t2)
    den = jnp.where(pos, 1.0 + 2.0 * t + 2.0 * t2, 2.0 + 2.0 * t + t2)
    return x_f32 * num, den


def _mila_kernel(x_ref, o_ref, *, beta):
    # Compute in f32 regardless of storage dtype (bf16-safe, v5e-safe).
    x = x_ref[...].astype(jnp.float32)
    xnum, den = _mila_math(x, beta)
    # Exact reciprocal: kernel stays HBM-bound, keeps full f32 accuracy.
    y = xnum * pl.reciprocal(den, approx=False)
    o_ref[...] = y.astype(o_ref.dtype)


def _pick_block_rows(rows: int, itemsize: int) -> int:
    """Rows per block: ~_TARGET_BLOCK_BYTES, tile-aligned, >= _MIN_GRID steps when possible."""
    # Full packed (8,128) tiles per dtype: 8 rows f32, 16 bf16, 32 int8.
    align = max(_SUBLANE, 32 // itemsize)
    if rows <= align:
        return rows                      # single block equal to the full dim (legal)
    target = _TARGET_BLOCK_BYTES // (_LANE * itemsize)   # multiple of `align`
    # Keep >= _MIN_GRID grid steps (when enough work) so v7x can use both TCs.
    steps = min(_MIN_GRID, max(1, rows // align))
    split = pl.cdiv(pl.cdiv(rows, steps), align) * align
    return min(target, split)


def _mila_2d(x2d: jax.Array, beta: float) -> jax.Array:
    """Run the Pallas kernel over a lane-dense (rows, 128) array."""
    rows, lanes = x2d.shape
    assert lanes == _LANE
    block_rows = _pick_block_rows(rows, x2d.dtype.itemsize)
    grid = (pl.cdiv(rows, block_rows),)   # partial last block is masked by Pallas

    n = rows * lanes
    cost = pl.CostEstimate(
        flops=12 * n,
        transcendentals=n,
        bytes_accessed=2 * n * x2d.dtype.itemsize,
    )

    return pl.pallas_call(
        functools.partial(_mila_kernel, beta=float(beta)),
        out_shape=jax.ShapeDtypeStruct((rows, _LANE), x2d.dtype),
        grid=grid,
        in_specs=[pl.BlockSpec((block_rows, _LANE), lambda i: (i, 0))],
        out_specs=pl.BlockSpec((block_rows, _LANE), lambda i: (i, 0)),
        compiler_params=pltpu.CompilerParams(
            dimension_semantics=("parallel",),
            vmem_limit_bytes=32 << 20,
        ),
        cost_estimate=cost,
    )(x2d)


@functools.partial(jax.jit, static_argnames=("beta",))
def mila(x: jax.Array, beta: float = -0.25) -> jax.Array:
    """Apply the Mila activation element-wise using a Pallas TPU kernel."""
    orig_shape = x.shape
    orig_dtype = x.dtype
    n = x.size
    if n == 0:
        return x

    x_flat = x.reshape(-1)
    n_main = (n // _LANE) * _LANE          # largest lane-aligned prefix

    if n_main == n:
        # Fast path: free reshape to (rows, 128); no pad / slice / concat.
        return _mila_2d(x_flat.reshape(-1, _LANE), beta).reshape(orig_shape)

    # Ragged path: aligned prefix through the kernel, <128-element tail in jnp.
    tail_in = x_flat[n_main:].astype(jnp.float32)
    t_num, t_den = _mila_math(tail_in, float(beta))
    tail_out = (t_num / t_den).astype(orig_dtype)
    if n_main == 0:
        return tail_out.reshape(orig_shape)

    main_out = _mila_2d(x_flat[:n_main].reshape(-1, _LANE), beta).reshape(-1)
    return jnp.concatenate([main_out, tail_out]).reshape(orig_shape)


def mila_ref(x, beta=-0.25):
    return x * jnp.tanh(jax.nn.softplus(x.astype(jnp.float32) + beta)).astype(x.dtype)


if __name__ == "__main__":
    key = jax.random.PRNGKey(0)

    # 1) Aligned fast path: NCHW, numel = 2048 (multiple of 128) -> grid of 2 blocks.
    x1 = jax.random.normal(key, (2, 4, 16, 16), dtype=jnp.float32)
    out1 = jax.block_until_ready(mila(x1, beta=-0.25))
    ref1 = mila_ref(x1, beta=-0.25)
    assert out1.shape == x1.shape and out1.dtype == x1.dtype
    assert jnp.allclose(out1, ref1, atol=1e-5, rtol=1e-5)

    # 2) Tiny ragged case (numel = 105 < 128): handled by the jnp tail path.
    x2 = jax.random.normal(jax.random.PRNGKey(1), (3, 5, 7), dtype=jnp.float32)
    out2 = jax.block_until_ready(mila(x2, beta=-0.25))
    ref2 = mila_ref(x2, beta=-0.25)
    assert out2.shape == x2.shape and out2.dtype == x2.dtype
    assert jnp.allclose(out2, ref2, atol=1e-5, rtol=1e-5)

    # 3) Ragged case exercising kernel prefix + tail (numel = 1050).
    x3 = jax.random.normal(jax.random.PRNGKey(2), (3, 50, 7), dtype=jnp.float32)
    out3 = jax.block_until_ready(mila(x3, beta=-0.25))
    ref3 = mila_ref(x3, beta=-0.25)
    assert out3.shape == x3.shape and out3.dtype == x3.dtype
    assert jnp.allclose(out3, ref3, atol=1e-5, rtol=1e-5)

    # 4) bf16 aligned case (numel = 1024), f32 internal math.
    x4 = jax.random.normal(jax.random.PRNGKey(3), (4, 8, 32), dtype=jnp.bfloat16)
    out4 = jax.block_until_ready(mila(x4, beta=-0.25))
    ref4 = mila_ref(x4, beta=-0.25)
    assert out4.shape == x4.shape and out4.dtype == x4.dtype
    assert jnp.allclose(out4.astype(jnp.float32), ref4.astype(jnp.float32),
                        atol=2e-2, rtol=2e-2)

    print("KERNEL_OK")
</pallas_src>

<mosaic_0001>
module attributes {stable_mosaic.version = 11 : i64} {
  func.func @_mila_kernel(%arg0: i32, %arg1: memref<8x128xf32, #tpu.memory_space<vmem>>, %arg2: memref<8x128xf32, #tpu.memory_space<vmem>>) attributes {dimension_semantics = [#tpu.dimension_semantics<parallel>], iteration_bounds = array<i64: 2>, scalar_prefetch = 0 : i64, scratch_operands = 0 : i64, tpu.core_type = #tpu.core_type<tc>, window_params = [{transform_indices = @transform_0, window_bounds = array<i64: 8, 128>}, {transform_indices = @transform_1, window_bounds = array<i64: 8, 128>}]} {
    %c0 = arith.constant 0 : index
    %c0_0 = arith.constant 0 : index
    %0 = vector.load %arg1[%c0, %c0_0] : memref<8x128xf32, #tpu.memory_space<vmem>>, vector<8x128xf32>
    %cst = arith.constant -2.500000e-01 : f32
    %1 = vector.broadcast %cst : f32 to vector<8x128xf32>
    %2 = arith.addf %0, %1 : vector<8x128xf32>
    %3 = math.absf %2 : vector<8x128xf32>
    %cst_1 = arith.constant 0.000000e+00 : f32
    %4 = vector.broadcast %cst_1 : f32 to vector<8x128xf32>
    %5 = arith.subf %4, %3 : vector<8x128xf32>
    %6 = math.exp %5 : vector<8x128xf32>
    %7 = arith.mulf %6, %6 : vector<8x128xf32>
    %cst_2 = arith.constant 0.000000e+00 : f32
    %8 = vector.broadcast %cst_2 : f32 to vector<8x128xf32>
    %9 = arith.cmpf ogt, %2, %8 : vector<8x128xf32>
    %cst_3 = arith.constant 2.000000e+00 : f32
    %10 = vector.broadcast %cst_3 : f32 to vector<8x128xf32>
    %11 = arith.mulf %10, %6 : vector<8x128xf32>
    %cst_4 = arith.constant 1.000000e+00 : f32
    %12 = vector.broadcast %cst_4 : f32 to vector<8x128xf32>
    %13 = arith.addf %12, %11 : vector<8x128xf32>
    %cst_5 = arith.constant 2.000000e+00 : f32
    %14 = vector.broadcast %cst_5 : f32 to vector<8x128xf32>
    %15 = arith.mulf %14, %6 : vector<8x128xf32>
    %16 = arith.addf %15, %7 : vector<8x128xf32>
    %17 = arith.select %9, %13, %16 : vector<8x128xi1>, vector<8x128xf32>
    %cst_6 = arith.constant 2.000000e+00 : f32
    %18 = vector.broadcast %cst_6 : f32 to vector<8x128xf32>
    %19 = arith.mulf %18, %6 : vector<8x128xf32>
    %cst_7 = arith.constant 1.000000e+00 : f32
    %20 = vector.broadcast %cst_7 : f32 to vector<8x128xf32>
    %21 = arith.addf %20, %19 : vector<8x128xf32>
    %cst_8 = arith.constant 2.000000e+00 : f32
    %22 = vector.broadcast %cst_8 : f32 to vector<8x128xf32>
    %23 = arith.mulf %22, %7 : vector<8x128xf32>
    %24 = arith.addf %21, %23 : vector<8x128xf32>
    %cst_9 = arith.constant 2.000000e+00 : f32
    %25 = vector.broadcast %cst_9 : f32 to vector<8x128xf32>
    %26 = arith.mulf %25, %6 : vector<8x128xf32>
    %cst_10 = arith.constant 2.000000e+00 : f32
    %27 = vector.broadcast %cst_10 : f32 to vector<8x128xf32>
    %28 = arith.addf %27, %26 : vector<8x128xf32>
    %29 = arith.addf %28, %7 : vector<8x128xf32>
    %30 = arith.select %9, %24, %29 : vector<8x128xi1>, vector<8x128xf32>
    %31 = arith.mulf %0, %17 : vector<8x128xf32>
    %32 = tpu.reciprocal %30 : vector<8x128xf32> -> vector<8x128xf32>
    %33 = arith.mulf %31, %32 : vector<8x128xf32>
    %c0_11 = arith.constant 0 : index
    %c0_12 = arith.constant 0 : index
    %34 = vector.load %arg2[%c0_11, %c0_12] : memref<8x128xf32, #tpu.memory_space<vmem>>, vector<8x128xf32>
    tpu.vector_store %arg2[%c0_11, %c0_12], %33 {strides = array<i32>} : memref<8x128xf32, #tpu.memory_space<vmem>>, vector<8x128xf32>,
    return
  }
  func.func @transform_0(%arg0: i32) -> (i32, i32) {
    %c0_i32 = arith.constant 0 : i32
    %c0_i32_0 = arith.constant 0 : i32
    return %arg0, %c0_i32 : i32, i32
  }
  func.func @transform_1(%arg0: i32) -> (i32, i32) {
    %c0_i32 = arith.constant 0 : i32
    %c0_i32_0 = arith.constant 0 : i32
    return %arg0, %c0_i32 : i32, i32
  }
}

</mosaic_0001>

<bundles_post_ra>
// kernel: mila.1
= control target key start
LH: loop header
LB: loop body
LE: loop exit
PB: predicated region body
PF: predicated region fallthrough
CT: control target
= control target key end

     0   :  { %s238_s6 = smov 0   ;;  %s262_s0 = inlined_call_operand.vmem [shape: f32[16,128], index: 0, kind: input, shape index: {}]   ;;  %s263_s1 = inlined_call_operand.vmem [shape: f32[16,128], index: 1, kind: output, shape index: {}]  }
   0x1 LB: > { %s199_s7 = sadd.s32 4294967295, %s226_s6   ;;  %p203_p0 = scmp.ge.s32.totalorder %s226_s6, 1  ;;  %s226_s6 = sphi %s238_s6, %s11_s6  }
   0x2   : > { %p86_p1 = scmp.lt.s32.totalorder %s226_s6, 3 }
   0x4   : > { %p87_p2 = pnand %p203_p0, %p86_p1 }
   0x5   : > { %p104_p3 = scmp.lt.s32.totalorder (!%p87_p2), %s199_s7, 1 }
   0x6   : > { %90 = sbr.rel (%p87_p2) target bundleno = 57 (0x39), region = 24 }
   0xb   : > { %s265_s7 = smov (!%p104_p3, %s199_s7), 1 }
   0xc   : > { %s204_s8 = sshll.u32 %s265_s7, 3 }
   0xd   : > { %s107_s11 = scalar_lea.vmem %s262_s0, %s204_s8  ;;  %s111_s14 = scalar_lea.vmem %s263_s1, %s204_s8 }
   0xe   : > { %v112_v0 = vld [vmem:[%s107_s11] sm:$0xff] }
   0xf   : > { %v113_v1 = vadd.f32 -0.25, %v112_v0 }
  0x11   : > { %v114_v2 = vand.u32 2147483647, %v113_v1  ;;  %vm119_vm0 = vcmp.gt.f32.partialorder %v113_v1, 0.0 }
  0x13   : > { %v115_v3 = vsub.f32 0.0, %v114_v2 }
  0x15   : > { %v116_v4 = vmul.f32 1.442695, %v115_v3 }
  0x17   : > { %216 = vpow2.f32 %v116_v4 }
  0x1d   : > { %v217_v5 = vpop.eup %216 }
  0x1e   : > { %v118_v6 = vmul.f32 %v217_v5, %v217_v5  ;;  %v120_v7 = vmul.f32 2.0, %v217_v5 }
  0x20   : > { %v121_v8 = vadd.f32 1.0, %v120_v7  ;;  %v124_v9 = vmul.f32 2.0, %v118_v6  ;;  %v126_v10 = vadd.f32 2.0, %v120_v7  ;;  %v122_v15 = vadd.f32 %v120_v7, %v118_v6 }
  0x22   : > { %v125_v11 = vadd.f32 %v124_v9, %v121_v8  ;;  %v127_v12 = vadd.f32 %v126_v10, %v118_v6  ;;  %v123_v20 = vsel %vm119_vm0, %v121_v8, %v122_v15 }
  0x23   : > { %v129_v23 = vmul.f32 %v123_v20, %v112_v0 }
  0x24   : > { %v128_v13 = vsel %vm119_vm0, %v125_v11, %v127_v12 }
  0x25   : > { %218 = vrcp.f32 %v128_v13  ;;  %v141_v17 = vand.u32 2147483648, %v128_v13  ;;  %vm135_vm1 = vweird.f32 %v128_v13  ;;  %v139_v19 = vand.u32 2147483647, %v128_v13 }
  0x27   : > { %v142_v22 = vor.u32 1.1754944e-38, %v141_v17  ;;  %vm140_vm4 = vcmp.eq.f32.partialorder %v139_v19, 8.507059e+37 }
  0x2b   : > { %v219_v14 = vpop.eup %218 }
  0x2c   : > { %v131_v16 = vmul.f32 %v219_v14, %v128_v13  ;;  %vm136_vm2 = vweird.f32 %v219_v14 }
  0x2d   : > { %vm137_vm3 = vmor %vm135_vm1, %vm136_vm2 }
  0x2e   : > { %v132_v18 = vsub.f32 1.0, %v131_v16 }
  0x30   : > { %v133_v21 = vmul.f32 %v219_v14, %v132_v18 }
  0x32   : > { %v134_v24 = vadd.f32 %v219_v14, %v133_v21 }
  0x34   : > { %v138_v25 = vsel %vm137_vm3, %v219_v14, %v134_v24 }
  0x35   : > { %v143_v26 = vsel %vm140_vm4, %v142_v22, %v138_v25 }
  0x36   : > { %v144_v27 = vmul.f32 %v143_v26, %v129_v23 }
  0x38   : > { %145 = vst [vmem:[%s111_s14] sm:$0xff] %v144_v27 }
  0x39 PF: > { %s11_s6 = sadd.s32 1, %s226_s6  }
  0x3a   : > { %p8_p4 = scmp.ge.s32.totalorder %s11_s6, 4  }
  0x3c   :  { %10 = sbr.rel (!%p8_p4) target bundleno = 1 (0x1), region = 54 }

</bundles_post_ra>
